<compile_context>
chip_gen: v6e
topology: v6e:2x2x1
jax: 0.10.0
libtpu: 0.0.40
codegen_flags: <defaults>
</compile_context>

<pallas_src>
import math

import jax
import jax.numpy as jnp
from jax.experimental import pallas as pl
from jax.experimental.pallas import tpu as pltpu


_TARGET_BLOCK_BYTES = 2 * 1024 * 1024   # per-block fp32 output budget
_MAX_TB = 16384
_MIN_TB = 8


def _round_up(n, m):
    return ((n + m - 1) // m) * m


def _fused_embed_kernel(x_ref, w_ref, b_ref, o_ref):
    # x_ref: (tb, 1); w_ref/b_ref: (1, 1+2H); o_ref: (tb, 1+2H)
    x = x_ref[...].astype(jnp.float32)
    theta = x * w_ref[...] + b_ref[...]                     # (tb, 1+2H)
    # column 0: theta == x*1 + 0 == x (exact passthrough); rest: sin(theta)
    col = jax.lax.broadcasted_iota(jnp.int32, theta.shape, 1)
    fused = jnp.where(col == 0, theta, jnp.sin(theta))
    o_ref[...] = fused.astype(o_ref.dtype)


def learned_sinusoidal_embedding(x, weights):
    """x: (B,), weights: (1, half_dim). Returns (B, 1 + 2*half_dim)."""
    B = x.shape[0]
    half_dim = weights.shape[-1]
    d_out = 1 + 2 * half_dim
    out_dtype = jnp.result_type(x.dtype, weights.dtype)

    # Tiny O(half_dim) parameter transforms, done once outside the kernel.
    w2pi = weights.astype(jnp.float32).reshape(1, half_dim) * (2.0 * math.pi)
    w_full = jnp.concatenate(
        [jnp.ones((1, 1), jnp.float32), w2pi, w2pi], axis=-1)
    b_full = jnp.concatenate(
        [jnp.zeros((1, 1 + half_dim), jnp.float32),
         jnp.full((1, half_dim), 0.5 * math.pi, jnp.float32)],
        axis=-1,
    )

    # half_dim-aware tile: keep double-buffered output blocks small enough for
    # every generation's VMEM, big enough to amortize per-step overhead.
    row_bytes = d_out * 4
    tb = max(_MIN_TB, min(_TARGET_BLOCK_BYTES // row_bytes, _MAX_TB))
    tb = max(_MIN_TB, (tb // 8) * 8)
    b_ceil = _round_up(B, 8)
    if tb >= b_ceil:
        if B >= 2048:
            # Split into >=2 blocks so both v7x TensorCores get work.
            tb = _round_up(-(-B // 2), 8)
        else:
            tb = b_ceil
    grid = (pl.cdiv(B, tb),)

    x2 = x.reshape(B, 1)

    out = pl.pallas_call(
        _fused_embed_kernel,
        out_shape=jax.ShapeDtypeStruct((B, d_out), out_dtype),
        grid=grid,
        in_specs=[
            pl.BlockSpec((tb, 1), lambda i: (i, 0)),
            pl.BlockSpec((1, d_out), lambda i: (0, 0)),   # resident
            pl.BlockSpec((1, d_out), lambda i: (0, 0)),   # resident
        ],
        out_specs=pl.BlockSpec((tb, d_out), lambda i: (i, 0)),
        compiler_params=pltpu.CompilerParams(
            dimension_semantics=("parallel",)),
    )(x2, w_full, b_full)
    return out


def reference(x, weights):
    freqs = x[:, None].astype(jnp.float32) * weights * (2.0 * math.pi)
    return jnp.concatenate([x[:, None], jnp.sin(freqs), jnp.cos(freqs)], axis=-1)


def _check(B, dim, key):
    half_dim = dim // 2
    k_x, k_w = jax.random.split(key)
    weights = jax.random.normal(k_w, (1, half_dim), dtype=jnp.float32)
    x = jax.random.uniform(k_x, (B,), dtype=jnp.float32)

    out = jax.block_until_ready(learned_sinusoidal_embedding(x, weights))
    ref = reference(x, weights)
    assert out.shape == (B, 2 * half_dim + 1), (out.shape, (B, 2 * half_dim + 1))
    err = float(jnp.max(jnp.abs(out - ref)))
    assert err < 1e-4, err


if __name__ == "__main__":
    key = jax.random.PRNGKey(0)
    keys = jax.random.split(key, 4)
    _check(B=8, dim=32, key=keys[0])      # tiny batch, narrow output (masked tail)
    _check(B=200, dim=8, key=keys[1])     # ragged batch -> partial last block
    _check(B=16, dim=256, key=keys[2])    # wide, lane-dense-ish output
    _check(B=2050, dim=32, key=keys[3])   # >=2 blocks (v7x megacore split path)
    print("KERNEL_OK")
</pallas_src>

<mosaic_0001>
module attributes {stable_mosaic.version = 11 : i64} {
  func.func @_fused_embed_kernel(%arg0: i32, %arg1: memref<8x1xf32, #tpu.memory_space<vmem>>, %arg2: memref<1x33xf32, #tpu.memory_space<vmem>>, %arg3: memref<1x33xf32, #tpu.memory_space<vmem>>, %arg4: memref<8x33xf32, #tpu.memory_space<vmem>>) attributes {dimension_semantics = [#tpu.dimension_semantics<parallel>], iteration_bounds = array<i64: 1>, scalar_prefetch = 0 : i64, scratch_operands = 0 : i64, tpu.core_type = #tpu.core_type<tc>, window_params = [{transform_indices = @transform_0, window_bounds = array<i64: 8, 1>}, {pipeline_mode = #tpu.pipeline_mode<synchronous>, transform_indices = @transform_1, window_bounds = array<i64: 1, 33>}, {pipeline_mode = #tpu.pipeline_mode<synchronous>, transform_indices = @transform_2, window_bounds = array<i64: 1, 33>}, {transform_indices = @transform_3, window_bounds = array<i64: 8, 33>}]} {
    %c0 = arith.constant 0 : index
    %c0_0 = arith.constant 0 : index
    %0 = vector.load %arg1[%c0, %c0_0] : memref<8x1xf32, #tpu.memory_space<vmem>>, vector<8x1xf32>
    %c0_1 = arith.constant 0 : index
    %c0_2 = arith.constant 0 : index
    %1 = vector.load %arg2[%c0_1, %c0_2] : memref<1x33xf32, #tpu.memory_space<vmem>>, vector<1x33xf32>
    %2 = vector.broadcast %0 : vector<8x1xf32> to vector<8x33xf32>
    %3 = vector.broadcast %1 : vector<1x33xf32> to vector<8x33xf32>
    %4 = arith.mulf %2, %3 : vector<8x33xf32>
    %c0_3 = arith.constant 0 : index
    %c0_4 = arith.constant 0 : index
    %5 = vector.load %arg3[%c0_3, %c0_4] : memref<1x33xf32, #tpu.memory_space<vmem>>, vector<1x33xf32>
    %6 = vector.broadcast %5 : vector<1x33xf32> to vector<8x33xf32>
    %7 = arith.addf %4, %6 : vector<8x33xf32>
    %8 = tpu.iota {dimensions = array<i32: 1>} : vector<8x33xi32>
    %c0_i32 = arith.constant 0 : i32
    %9 = vector.broadcast %c0_i32 : i32 to vector<8x33xi32>
    %10 = arith.cmpi eq, %8, %9 : vector<8x33xi32>
    %11 = math.sin %7 : vector<8x33xf32>
    %12 = arith.select %10, %7, %11 : vector<8x33xi1>, vector<8x33xf32>
    %c0_5 = arith.constant 0 : index
    %c0_6 = arith.constant 0 : index
    %13 = vector.load %arg4[%c0_5, %c0_6] : memref<8x33xf32, #tpu.memory_space<vmem>>, vector<8x33xf32>
    tpu.vector_store %arg4[%c0_5, %c0_6], %12 {strides = array<i32>} : memref<8x33xf32, #tpu.memory_space<vmem>>, vector<8x33xf32>,
    return
  }
  func.func @transform_0(%arg0: i32) -> (i32, i32) {
    %c0_i32 = arith.constant 0 : i32
    %c0_i32_0 = arith.constant 0 : i32
    return %arg0, %c0_i32 : i32, i32
  }
  func.func @transform_1(%arg0: i32) -> (i32, i32) {
    %c0_i32 = arith.constant 0 : i32
    %c0_i32_0 = arith.constant 0 : i32
    %c0_i32_1 = arith.constant 0 : i32
    return %c0_i32, %c0_i32_0 : i32, i32
  }
  func.func @transform_2(%arg0: i32) -> (i32, i32) {
    %c0_i32 = arith.constant 0 : i32
    %c0_i32_0 = arith.constant 0 : i32
    %c0_i32_1 = arith.constant 0 : i32
    return %c0_i32, %c0_i32_0 : i32, i32
  }
  func.func @transform_3(%arg0: i32) -> (i32, i32) {
    %c0_i32 = arith.constant 0 : i32
    %c0_i32_0 = arith.constant 0 : i32
    return %arg0, %c0_i32 : i32, i32
  }
}

</mosaic_0001>

<bundles_post_ra>
// kernel: tpu_custom_call.1
= control target key start
LH: loop header
LB: loop body
LE: loop exit
PB: predicated region body
PF: predicated region fallthrough
CT: control target
= control target key end

     0   :  { %v206_v1 = vmov 0   ;;  %s268_s0 = inlined_call_operand.vmem [shape: f32[8,1], index: 0, kind: input, shape index: {}]   ;;  %s269_s1 = inlined_call_operand.vmem [shape: f32[1,33], index: 1, kind: input, shape index: {}]   ;;  %s270_s2 = inlined_call_operand.vmem [shape: f32[1,33], index: 2, kind: input, shape index: {}]   ;;  %s271_s3 = inlined_call_operand.hbm [shape: f32[8,33], index: 3, kind: output, shape index: {}]  }
   0x1   :  { %v15_v0 = vld [vmem:[%s268_s0] sm:$0xff]  ;;  %179 = vset.pattern.permute.xlu0 %v206_v1 }
   0x2   :  { %8 = vsyncpa [#allocation3], 0  ;;  %19 = vperm.xlu0 %179, %v15_v0   ;;  %v161_v2 = vld [vmem:[%s269_s1] ss:$0 sm:$0xff]  ;;  %v207_v17 = vmov 683565275  }
   0x3   :  { %v162_v3 = vld [vmem:[%s270_s2] ss:$0 sm:$0xff]  ;;  %v208_v19 = vmov 2475754826   ;;  %v209_v22 = vmov 2131351028  }
   0x4   :  { %v210_v25 = vmov 2102212464   ;;  %v211_v28 = vmov 920167782   ;;  %v212_v31 = vmov 1326507024  }
   0x5   :  { %s213_s0 = smov [#allocation2]   ;;  %vm145_vm14 = vcmask 269312  }
   0x6   :  { %s153_s1 = sshll.u32 %s213_s0, 4  ;;  %s154_s1 = int_to_ptr.vmem [resolvable:$true] %s153_s1 }
   0x7   :  { %s184_s2 = scalar_lea.vmem %s154_s1, 128  ;;  %p189_p1 = scmp.lt.s32.totalorder %s154_s1, %s154_s1 }
   0x8   :  { %p185_p0 = scmp.ne.s32.totalorder %s154_s1, %s184_s2  ;;  %p190_p2 = scmp.lt.s32.totalorder %s184_s2, %s184_s2 }
   0xa   :  { %p191_p3 = por %p190_p2, %p189_p1 }
   0xc   :  { %p192_p4 = pnand %p191_p3, %p185_p0 }
  0x7d   :  { %v20_v4 = vpop.permute.xlu0 %19 }
  0x7e   :  { %v28_v5 = vmul.f32 %v161_v2, %v20_v4 }
  0x80   :  { %v243_v6 = vadd.f32 %v162_v3, %v28_v5 }
  0x82   :  { %v43_v7 = vand.u32 2139095040, %v243_v6  ;;  %v40_v11 = vand.u32 2147483647, %v243_v6  ;;  %vm42_vm7 = vcmp.lt.s32.totalorder %v243_v6, 0  ;;  %vm132_vm13 = vweird.f32 %v243_v6 }
  0x84   :  { %v44_v8 = vshrl.u32 %v43_v7, 23  ;;  %v47_v15 = vand.u32 8388607, %v40_v11  ;;  %vm41_vm8 = vcmp.le.f32.partialorder %v40_v11, 0.7853982 }
  0x86   :  { %v163_v9 = vadd.s32 4294967169, %v44_v8  ;;  %v48_v33 = vor.u32 8388608, %v47_v15 }
  0x88   :  { %v50_v10 = vadd.s32 1, %v163_v9  ;;  %v88_v47 = vshll.u32 %v48_v33, 8 }
  0x8a   :  { %vm51_vm0 = vcmp.gt.s32.totalorder %v50_v10, 0 }
  0x8b   :  { %v52_v12 = vsel %vm51_vm0, %v50_v10, 0 }
  0x8c   :  { %v54_v13 = vand.u32 31, %v52_v12  ;;  %v53_v16 = vshrl.u32 %v52_v12, 5 }
  0x8e   :  { %v55_v14 = vsub.s32 32, %v54_v13  ;;  %v57_v18 = vshll.u32 %v207_v17, %v54_v13  ;;  %v60_v20 = vshll.u32 %v208_v19, %v54_v13  ;;  %v63_v24 = vshll.u32 %v209_v22, %v54_v13 }
  0x8f   :  { %v66_v27 = vshll.u32 %v210_v25, %v54_v13  ;;  %v69_v30 = vshll.u32 %v211_v28, %v54_v13  ;;  %vm72_vm1 = vcmp.lt.s32.totalorder %v53_v16, 1  ;;  %vm75_vm2 = vcmp.lt.s32.totalorder %v53_v16, 4 }
  0x90   :  { %v58_v21 = vshrl.u32 %v208_v19, %v55_v14  ;;  %v61_v23 = vshrl.u32 %v209_v22, %v55_v14  ;;  %v64_v26 = vshrl.u32 %v210_v25, %v55_v14  ;;  %v67_v29 = vshrl.u32 %v211_v28, %v55_v14 }
  0x91   :  { %v70_v32 = vshrl.u32 %v212_v31, %v55_v14  ;;  %v56_v42 = vshrl.u32 %v207_v17, %v55_v14  ;;  %vm74_vm3 = vcmp.lt.s32.totalorder %v53_v16, 3  ;;  %vm73_vm4 = vcmp.lt.s32.totalorder %v53_v16, 2 }
  0x92   :  { %v59_v34 = vor.u32 %v58_v21, %v57_v18  ;;  %v62_v35 = vor.u32 %v61_v23, %v60_v20  ;;  %v65_v36 = vor.u32 %v64_v26, %v63_v24  ;;  %v68_v37 = vor.u32 %v67_v29, %v66_v27 }
  0x93   :  { %v71_v38 = vor.u32 %v70_v32, %v69_v30  ;;  %v37_v27 = vlaneseq }
  0x94   :  { %v77_v39 = vsel %vm75_vm2, %v65_v36, 2102212464  ;;  %v80_v40 = vsel %vm72_vm1, %v59_v34, %v62_v35  ;;  %v84_v41 = vsel %vm72_vm1, %v62_v35, %v65_v36  ;;  %v81_v43 = vsel %vm75_vm2, %v68_v37, 920167782 }
  0x95   :  { %v85_v44 = vsel %vm75_vm2, %v71_v38, 1326507024  ;;  %v82_v45 = vsel %vm74_vm3, %v65_v36, %v81_v43  ;;  %v76_v48 = vsel %vm72_vm1, %v56_v42, %v59_v34  ;;  %v78_v49 = vsel %vm74_vm3, %v62_v35, %v77_v39 }
  0x96   :  { %v86_v46 = vsel %vm74_vm3, %v68_v37, %v85_v44  ;;  %v83_v50 = vsel %vm73_vm4, %v80_v40, %v82_v45  ;;  %v79_v56 = vsel %vm73_vm4, %v76_v48, %v78_v49  ;;  %v38_v30 = vand.u32 127, %v37_v27 }
  0x97   :  { %v87_v51 = vsel %vm73_vm4, %v84_v41, %v86_v46  ;;  %v252_v54 = vmul.u32.u64.low %v88_v47, %v83_v50  ;;  %v253_v55 = vmul.u32.u64.high %v88_v47, %v83_v50, %v252_v54  ;;  %v95_v58 = vmul.u32 %v88_v47, %v79_v56 }
  0x98   :  { %v249_v52 = vmul.u32.u64.low %v88_v47, %v87_v51  ;;  %v250_v53 = vmul.u32.u64.high %v88_v47, %v87_v51, %v249_v52  ;;  %vm39_vm11 = vcmp.eq.s32.totalorder %v38_v30, 0 }
  0x99   :  { %v98_v57 = vadd.s32 1, %v253_v55 }
  0x9a   :  { %vm97_vm5 = vc.u32 %v250_v53, %v252_v54  ;;  %v96_v7 = vadd.s32 %v252_v54, %v250_v53 }
  0x9b   :  { %v99_v59 = vsel %vm97_vm5, %v98_v57, %v253_v55 }
  0x9c   :  { %v100_v60 = vadd.s32 %v99_v59, %v95_v58 }
  0x9e   :  { %v101_v61 = vadd.s32 536870912, %v100_v60 }
  0xa0   :  { %v102_v62 = vshrl.u32 %v101_v61, 30 }
  0xa2   :  { %v103_v63 = vshll.u32 %v102_v62, 30  ;;  %v126_v21 = vsub.s32 4, %v102_v62 }
  0xa4   :  { %v104_v0 = vsub.s32 %v100_v60, %v103_v63  ;;  %v127_v24 = vsel %vm42_vm7, %v126_v21, %v102_v62 }
  0xa5   :  { %v129_v25 = vsel %vm41_vm8, 0, %v127_v24 }
  0xa6   :  { %v106_v1 = vsub.s32 0, %v104_v0  ;;  %v133_v26 = vadd.s32 3, %v129_v25 }
  0xa8   :  { %v164_v2 = vmin.u32 %v106_v1, %v104_v0  ;;  %v134_v28 = vand.u32 3, %v133_v26 }
  0xaa   :  { %v108_v3 = vclz %v164_v2  ;;  %vm139_vm9 = vcmp.eq.s32.totalorder %v134_v28, 2  ;;  %vm136_vm10 = vcmp.eq.s32.totalorder %v134_v28, 0  ;;  %vm135_vm12 = vcmp.lt.s32.totalorder %v134_v28, 2 }
  0xac   :  { %v165_v4 = vadd.s32 4294967294, %v108_v3 }
  0xae   :  { %vm166_vm6 = vcmp.lt.s32.totalorder %v165_v4, 0 }
  0xaf   :  { %v111_v5 = vsel %vm166_vm6, 0, %v165_v4 }
  0xb0   :  { %v112_v8 = vsub.s32 32, %v111_v5  ;;  %v116_v9 = vsub.s32 4294967266, %v111_v5  ;;  %v113_v10 = vshll.u32 %v104_v0, %v111_v5 }
  0xb2   :  { %v114_v12 = vshrl.u32 %v96_v7, %v112_v8  ;;  %v117_v13 = vadd.s32 127, %v116_v9 }
  0xb4   :  { %v115_v14 = vor.u32 %v114_v12, %v113_v10  ;;  %v118_v15 = vshll.u32 %v117_v13, 23 }
  0xb6   :  { %v119_v16 = vor.u32 4788187, %v118_v15  ;;  %v122_v18 = vcvt.s32.f32 %v115_v14 }
  0xb8   :  { %v120_v17 = vand.u32 2147483647, %v119_v16 }
  0xba   :  { %v123_v19 = vmul.f32 %v122_v18, %v120_v17 }
  0xbc   :  { %v124_v20 = vxor.u32 2147483648, %v123_v19 }
  0xbe   :  { %v125_v22 = vsel %vm42_vm7, %v124_v20, %v123_v19 }
  0xbf   :  { %v128_v23 = vsel %vm41_vm8, %v243_v6, %v125_v22 }
  0xc0   :  { %180 = vcosq.f32 %v128_v23 }
  0xc1   :  { %182 = vsinq.f32 %v128_v23 }
  0xcd   :  { %v181_v29 = vpop.eup %180 }
  0xce   :  { %v183_v31 = vpop.eup %182  ;;  %v140_v32 = vxor.u32 2147483648, %v181_v29 }
  0xcf   :  { %v137_v33 = vxor.u32 2147483648, %v183_v31 }
  0xd0   :  { %v141_v34 = vsel %vm139_vm9, %v140_v32, %v183_v31 }
  0xd1   :  { %v138_v11 = vsel %vm136_vm10, %v181_v29, %v137_v33 }
  0xd2   :  { %v142_v35 = vsel %vm135_vm12, %v138_v11, %v141_v34 }
  0xd3   :  { %v143_v36 = vsel %vm132_vm13, nan, %v142_v35 }
  0xd4   :  { %v144_v37 = vsel %vm39_vm11, %v243_v6, %v143_v36 }
  0xd5   :  { %146 = vst.msk [vmem:[#allocation2] sm:$0xff] %vm145_vm14, %v144_v37 }
  0xd6   :  { %195 = shalt.err (!%p192_p4)
}
  0xd7   :  { %156 = dma.vmem_to_hbm [thread:$0]  %s154_s1, 128, %s271_s3, [#allocation3]  }
  0xd8   :  { %204 = dma.done.wait [#allocation3], 128  }
  0xd9   :  { %205 = vsyncadd [#allocation3], 4294967168 }
  0xda   :  { %160 = vsyncpa [#allocation3], 1 }

</bundles_post_ra>
